<compile_context>
chip_gen: v5e
topology: v5e:2x2
jax: 0.10.0
libtpu: 0.0.40
codegen_flags: <defaults>
</compile_context>

<pallas_src>
import jax
import jax.numpy as jnp
from jax.experimental import pallas as pl
from jax.experimental.pallas import tpu as pltpu

STATE_SIZE = 8
ACTION_SIZE = 4
HIDDEN_SIZE = 32
BATCH = 8
EPS = 1e-5
NEG_SLOPE = 0.01

# Packed-parameter slab layout (rows x HIDDEN_SIZE cols), all 8-sublane aligned
# where it matters:
#   rows  0: 8   -> w1  (STATE_SIZE, HIDDEN)
#   rows  8:40  -> w2  (HIDDEN, HIDDEN)
#   rows 40:72  -> w3  (HIDDEN, HIDDEN) zero-padded; only cols [:ACTION_SIZE] used
#   rows 72:80  -> per-feature vectors: g1, be1, g2, be2, b3(padded), zeros...
ROW_W1 = 0
ROW_W2 = 8
ROW_W3 = 40
ROW_VEC = 72
PACK_ROWS = 80


def _leaky_relu(h):
    return jnp.where(h > 0, h, NEG_SLOPE * h)


def _bn_fold(h, gamma, beta):
    """Training-mode BatchNorm1d folded into a single FMA."""
    mean = jnp.mean(h, axis=0, keepdims=True)
    var = jnp.mean((h - mean) ** 2, axis=0, keepdims=True)
    scale = gamma * jax.lax.rsqrt(var + EPS)
    shift = beta - mean * scale
    return h * scale + shift


def actor_kernel(x_ref, p_ref, out_ref):
    x = x_ref[...].astype(jnp.float32)

    # Static, zero-cost ref slices (all row offsets are multiples of 8).
    w1 = p_ref[ROW_W1:ROW_W1 + STATE_SIZE, :]        # (8, 32)
    w2 = p_ref[ROW_W2:ROW_W2 + HIDDEN_SIZE, :]       # (32, 32)
    w3 = p_ref[ROW_W3:ROW_W3 + HIDDEN_SIZE, :]       # (32, 32) zero-padded cols
    vec = p_ref[ROW_VEC:ROW_VEC + 8, :]               # (8, 32) vector pack
    g1, be1 = vec[0:1, :], vec[1:2, :]
    g2, be2 = vec[2:3, :], vec[3:4, :]
    b3 = vec[4:5, :]                                   # padded cols are zero

    # Linear 1 (bias dropped: cancelled by training-mode BN) -> BN -> LeakyReLU
    h = jnp.dot(x, w1, preferred_element_type=jnp.float32)
    h = _leaky_relu(_bn_fold(h, g1, be1))

    # Linear 2 (bias dropped) -> BN -> LeakyReLU
    h = jnp.dot(h, w2, preferred_element_type=jnp.float32)
    h = _leaky_relu(_bn_fold(h, g2, be2))

    # Linear 3 -> Softmax(dim=-1). Padded w3/b3 columns are zero, so slicing the
    # first ACTION_SIZE logits before softmax is exact.
    logits = jnp.dot(h, w3, preferred_element_type=jnp.float32) + b3
    logits = logits[:, :ACTION_SIZE]
    m = jnp.max(logits, axis=-1, keepdims=True)
    e = jnp.exp(logits - m)
    denom = jnp.sum(e, axis=-1, keepdims=True)
    out_ref[...] = (e * pl.reciprocal(denom)).astype(out_ref.dtype)


def pack_params(params):
    """Pack all parameters into a single (PACK_ROWS, HIDDEN_SIZE) f32 slab.

    b1/b2 are intentionally omitted (mathematically dead before training-mode BN).
    """
    (w1, b1, g1, be1, w2, b2, g2, be2, w3, b3) = params
    slab = jnp.zeros((PACK_ROWS, HIDDEN_SIZE), jnp.float32)
    slab = slab.at[ROW_W1:ROW_W1 + STATE_SIZE, :].set(w1)
    slab = slab.at[ROW_W2:ROW_W2 + HIDDEN_SIZE, :].set(w2)
    slab = slab.at[ROW_W3:ROW_W3 + HIDDEN_SIZE, :ACTION_SIZE].set(w3)
    slab = slab.at[ROW_VEC + 0, :].set(g1[0])
    slab = slab.at[ROW_VEC + 1, :].set(be1[0])
    slab = slab.at[ROW_VEC + 2, :].set(g2[0])
    slab = slab.at[ROW_VEC + 3, :].set(be2[0])
    slab = slab.at[ROW_VEC + 4, :ACTION_SIZE].set(b3[0])
    return slab


def model_actor_forward(x, packed):
    B = x.shape[0]
    vmem = pl.BlockSpec(memory_space=pltpu.MemorySpace.VMEM)
    return pl.pallas_call(
        actor_kernel,
        out_shape=jax.ShapeDtypeStruct((B, ACTION_SIZE), jnp.float32),
        in_specs=[vmem, vmem],
        out_specs=vmem,
    )(x, packed)


def init_params(key):
    """Deterministic parameter init matching PyTorch Linear/BatchNorm1d shapes."""
    ks = jax.random.split(key, 6)

    def linear(kw, kb, fan_in, fan_out):
        bound = 1.0 / jnp.sqrt(fan_in)
        w = jax.random.uniform(kw, (fan_in, fan_out), jnp.float32, -bound, bound)
        b = jax.random.uniform(kb, (1, fan_out), jnp.float32, -bound, bound)
        return w, b

    w1, b1 = linear(ks[0], ks[1], STATE_SIZE, HIDDEN_SIZE)
    w2, b2 = linear(ks[2], ks[3], HIDDEN_SIZE, HIDDEN_SIZE)
    w3, b3 = linear(ks[4], ks[5], HIDDEN_SIZE, ACTION_SIZE)

    # BatchNorm1d affine params: gamma=1, beta=0 (PyTorch defaults)
    g1 = jnp.ones((1, HIDDEN_SIZE), jnp.float32)
    be1 = jnp.zeros((1, HIDDEN_SIZE), jnp.float32)
    g2 = jnp.ones((1, HIDDEN_SIZE), jnp.float32)
    be2 = jnp.zeros((1, HIDDEN_SIZE), jnp.float32)

    return (w1, b1, g1, be1, w2, b2, g2, be2, w3, b3)


def reference_forward(x, params):
    """Faithful (unfused, with biases) PyTorch-semantics reference."""
    (w1, b1, g1, be1, w2, b2, g2, be2, w3, b3) = params

    def bn(h, gamma, beta):
        mean = jnp.mean(h, axis=0, keepdims=True)
        var = jnp.mean((h - mean) ** 2, axis=0, keepdims=True)
        return (h - mean) * jax.lax.rsqrt(var + EPS) * gamma + beta

    h = x @ w1 + b1
    h = _leaky_relu(bn(h, g1, be1))
    h = h @ w2 + b2
    h = _leaky_relu(bn(h, g2, be2))
    logits = h @ w3 + b3
    return jax.nn.softmax(logits, axis=-1)


if __name__ == "__main__":
    key = jax.random.PRNGKey(0)
    kx, kp = jax.random.split(key)
    x = jax.random.normal(kx, (BATCH, STATE_SIZE), jnp.float32)
    params = init_params(kp)
    packed = pack_params(params)

    out = model_actor_forward(x, packed)
    out = jax.block_until_ready(out)

    ref = reference_forward(x, params)
    assert out.shape == (BATCH, ACTION_SIZE)
    # BN folding + dropping the (mathematically dead) pre-BN biases changes
    # rounding order only; allow a slightly looser fp32 tolerance.
    assert jnp.allclose(out, ref, atol=5e-5, rtol=5e-5)
    assert jnp.allclose(jnp.sum(out, axis=-1), jnp.ones((BATCH,)), atol=1e-5)

    print("KERNEL_OK")
</pallas_src>

<mosaic_0001>
module attributes {stable_mosaic.version = 11 : i64} {
  func.func @actor_kernel(%arg0: memref<8x8xf32, #tpu.memory_space<vmem>>, %arg1: memref<80x32xf32, #tpu.memory_space<vmem>>, %arg2: memref<8x4xf32, #tpu.memory_space<vmem>>) attributes {dimension_semantics = [], scalar_prefetch = 0 : i64, scratch_operands = 0 : i64, tpu.core_type = #tpu.core_type<tc>} {
    %c0 = arith.constant 0 : index
    %c0_0 = arith.constant 0 : index
    %0 = vector.load %arg0[%c0, %c0_0] : memref<8x8xf32, #tpu.memory_space<vmem>>, vector<8x8xf32>
    %c0_1 = arith.constant 0 : index
    %c0_2 = arith.constant 0 : index
    %1 = vector.load %arg1[%c0_1, %c0_2] : memref<80x32xf32, #tpu.memory_space<vmem>>, vector<8x32xf32>
    %c8 = arith.constant 8 : index
    %c0_3 = arith.constant 0 : index
    %2 = vector.load %arg1[%c8, %c0_3] : memref<80x32xf32, #tpu.memory_space<vmem>>, vector<32x32xf32>
    %c40 = arith.constant 40 : index
    %c0_4 = arith.constant 0 : index
    %3 = vector.load %arg1[%c40, %c0_4] : memref<80x32xf32, #tpu.memory_space<vmem>>, vector<32x32xf32>
    %c72 = arith.constant 72 : index
    %c0_5 = arith.constant 0 : index
    %4 = vector.load %arg1[%c72, %c0_5] : memref<80x32xf32, #tpu.memory_space<vmem>>, vector<8x32xf32>
    %5 = vector.extract_strided_slice %4 {offsets = [0, 0], sizes = [1, 32], strides = [1, 1]} : vector<8x32xf32> to vector<1x32xf32>
    %6 = vector.extract_strided_slice %4 {offsets = [1, 0], sizes = [1, 32], strides = [1, 1]} : vector<8x32xf32> to vector<1x32xf32>
    %7 = vector.extract_strided_slice %4 {offsets = [2, 0], sizes = [1, 32], strides = [1, 1]} : vector<8x32xf32> to vector<1x32xf32>
    %8 = vector.extract_strided_slice %4 {offsets = [3, 0], sizes = [1, 32], strides = [1, 1]} : vector<8x32xf32> to vector<1x32xf32>
    %9 = vector.extract_strided_slice %4 {offsets = [4, 0], sizes = [1, 32], strides = [1, 1]} : vector<8x32xf32> to vector<1x32xf32>
    %cst = arith.constant dense<0.000000e+00> : vector<8x32xf32>
    %10 = tpu.matmul %0, %1, %cst {dimension_numbers = #tpu.dot_dimension_numbers<[1], [0], [0], [1], [0, 0, 1, 1], [], []>} : vector<8x8xf32>, vector<8x32xf32>, vector<8x32xf32> -> vector<8x32xf32>
    %cst_6 = arith.constant dense<0.000000e+00> : vector<32xf32>
    %11 = vector.multi_reduction <add>, %10, %cst_6 [0] : vector<8x32xf32> to vector<32xf32>
    %12 = vector.shape_cast %11 : vector<32xf32> to vector<1x32xf32>
    %cst_7 = arith.constant 8.000000e+00 : f32
    %13 = vector.broadcast %cst_7 : f32 to vector<1x32xf32>
    %14 = arith.divf %12, %13 : vector<1x32xf32>
    %15 = vector.broadcast %14 : vector<1x32xf32> to vector<8x32xf32>
    %16 = arith.subf %10, %15 : vector<8x32xf32>
    %17 = arith.mulf %16, %16 : vector<8x32xf32>
    %cst_8 = arith.constant dense<0.000000e+00> : vector<32xf32>
    %18 = vector.multi_reduction <add>, %17, %cst_8 [0] : vector<8x32xf32> to vector<32xf32>
    %19 = vector.shape_cast %18 : vector<32xf32> to vector<1x32xf32>
    %cst_9 = arith.constant 8.000000e+00 : f32
    %20 = vector.broadcast %cst_9 : f32 to vector<1x32xf32>
    %21 = arith.divf %19, %20 : vector<1x32xf32>
    %cst_10 = arith.constant 9.99999974E-6 : f32
    %22 = vector.broadcast %cst_10 : f32 to vector<1x32xf32>
    %23 = arith.addf %21, %22 : vector<1x32xf32>
    %24 = math.rsqrt %23 : vector<1x32xf32>
    %25 = arith.mulf %5, %24 : vector<1x32xf32>
    %26 = arith.mulf %14, %25 : vector<1x32xf32>
    %27 = arith.subf %6, %26 : vector<1x32xf32>
    %28 = vector.broadcast %25 : vector<1x32xf32> to vector<8x32xf32>
    %29 = arith.mulf %10, %28 : vector<8x32xf32>
    %30 = vector.broadcast %27 : vector<1x32xf32> to vector<8x32xf32>
    %31 = arith.addf %29, %30 : vector<8x32xf32>
    %cst_11 = arith.constant 0.000000e+00 : f32
    %32 = vector.broadcast %cst_11 : f32 to vector<8x32xf32>
    %33 = arith.cmpf ogt, %31, %32 : vector<8x32xf32>
    %cst_12 = arith.constant 0.00999999977 : f32
    %34 = vector.broadcast %cst_12 : f32 to vector<8x32xf32>
    %35 = arith.mulf %34, %31 : vector<8x32xf32>
    %36 = arith.select %33, %31, %35 : vector<8x32xi1>, vector<8x32xf32>
    %cst_13 = arith.constant dense<0.000000e+00> : vector<8x32xf32>
    %37 = tpu.matmul %36, %2, %cst_13 {dimension_numbers = #tpu.dot_dimension_numbers<[1], [0], [0], [1], [0, 0, 1, 1], [], []>} : vector<8x32xf32>, vector<32x32xf32>, vector<8x32xf32> -> vector<8x32xf32>
    %cst_14 = arith.constant dense<0.000000e+00> : vector<32xf32>
    %38 = vector.multi_reduction <add>, %37, %cst_14 [0] : vector<8x32xf32> to vector<32xf32>
    %39 = vector.shape_cast %38 : vector<32xf32> to vector<1x32xf32>
    %cst_15 = arith.constant 8.000000e+00 : f32
    %40 = vector.broadcast %cst_15 : f32 to vector<1x32xf32>
    %41 = arith.divf %39, %40 : vector<1x32xf32>
    %42 = vector.broadcast %41 : vector<1x32xf32> to vector<8x32xf32>
    %43 = arith.subf %37, %42 : vector<8x32xf32>
    %44 = arith.mulf %43, %43 : vector<8x32xf32>
    %cst_16 = arith.constant dense<0.000000e+00> : vector<32xf32>
    %45 = vector.multi_reduction <add>, %44, %cst_16 [0] : vector<8x32xf32> to vector<32xf32>
    %46 = vector.shape_cast %45 : vector<32xf32> to vector<1x32xf32>
    %cst_17 = arith.constant 8.000000e+00 : f32
    %47 = vector.broadcast %cst_17 : f32 to vector<1x32xf32>
    %48 = arith.divf %46, %47 : vector<1x32xf32>
    %cst_18 = arith.constant 9.99999974E-6 : f32
    %49 = vector.broadcast %cst_18 : f32 to vector<1x32xf32>
    %50 = arith.addf %48, %49 : vector<1x32xf32>
    %51 = math.rsqrt %50 : vector<1x32xf32>
    %52 = arith.mulf %7, %51 : vector<1x32xf32>
    %53 = arith.mulf %41, %52 : vector<1x32xf32>
    %54 = arith.subf %8, %53 : vector<1x32xf32>
    %55 = vector.broadcast %52 : vector<1x32xf32> to vector<8x32xf32>
    %56 = arith.mulf %37, %55 : vector<8x32xf32>
    %57 = vector.broadcast %54 : vector<1x32xf32> to vector<8x32xf32>
    %58 = arith.addf %56, %57 : vector<8x32xf32>
    %cst_19 = arith.constant 0.000000e+00 : f32
    %59 = vector.broadcast %cst_19 : f32 to vector<8x32xf32>
    %60 = arith.cmpf ogt, %58, %59 : vector<8x32xf32>
    %cst_20 = arith.constant 0.00999999977 : f32
    %61 = vector.broadcast %cst_20 : f32 to vector<8x32xf32>
    %62 = arith.mulf %61, %58 : vector<8x32xf32>
    %63 = arith.select %60, %58, %62 : vector<8x32xi1>, vector<8x32xf32>
    %cst_21 = arith.constant dense<0.000000e+00> : vector<8x32xf32>
    %64 = tpu.matmul %63, %3, %cst_21 {dimension_numbers = #tpu.dot_dimension_numbers<[1], [0], [0], [1], [0, 0, 1, 1], [], []>} : vector<8x32xf32>, vector<32x32xf32>, vector<8x32xf32> -> vector<8x32xf32>
    %65 = vector.broadcast %9 : vector<1x32xf32> to vector<8x32xf32>
    %66 = arith.addf %64, %65 : vector<8x32xf32>
    %67 = vector.extract_strided_slice %66 {offsets = [0, 0], sizes = [8, 4], strides = [1, 1]} : vector<8x32xf32> to vector<8x4xf32>
    %cst_22 = arith.constant dense<0xFF800000> : vector<8xf32>
    %68 = vector.multi_reduction <maximumf>, %67, %cst_22 [1] : vector<8x4xf32> to vector<8xf32>
    %69 = vector.shape_cast %68 : vector<8xf32> to vector<8x1xf32>
    %70 = vector.broadcast %69 : vector<8x1xf32> to vector<8x4xf32>
    %71 = arith.subf %67, %70 : vector<8x4xf32>
    %72 = math.exp %71 : vector<8x4xf32>
    %cst_23 = arith.constant dense<0.000000e+00> : vector<8xf32>
    %73 = vector.multi_reduction <add>, %72, %cst_23 [1] : vector<8x4xf32> to vector<8xf32>
    %74 = vector.shape_cast %73 : vector<8xf32> to vector<8x1xf32>
    %75 = tpu.reciprocal %74 : vector<8x1xf32> -> vector<8x1xf32>
    %76 = vector.broadcast %75 : vector<8x1xf32> to vector<8x4xf32>
    %77 = arith.mulf %72, %76 : vector<8x4xf32>
    %c0_24 = arith.constant 0 : index
    %c0_25 = arith.constant 0 : index
    %78 = vector.load %arg2[%c0_24, %c0_25] : memref<8x4xf32, #tpu.memory_space<vmem>>, vector<8x4xf32>
    tpu.vector_store %arg2[%c0_24, %c0_25], %77 {strides = array<i32>} : memref<8x4xf32, #tpu.memory_space<vmem>>, vector<8x4xf32>,
    return
  }
}

</mosaic_0001>

<bundles_post_ra>
// kernel: tpu_custom_call.1
= control target key start
LH: loop header
LB: loop body
LE: loop exit
PB: predicated region body
PF: predicated region fallthrough
CT: control target
= control target key end

     0   :  { %vm22_vm0 = vcmask 64512   ;;  %v229_v2 = vmov 8.0   ;;  %vm46_vm1 = vcmask 261120   ;;  %vm185_vm11 = vcmask 31744   ;;  %s303_s1 = inlined_call_operand.vmem [shape: f32[80,32], index: 1, kind: input, shape index: {}]   ;;  %s304_s0 = inlined_call_operand.vmem [shape: f32[8,8], index: 0, kind: input, shape index: {}]   ;;  %s305_s2 = inlined_call_operand.vmem [shape: f32[8,4], index: 2, kind: output, shape index: {}]  }
   0x1   :  { %v12_v0 = vld [vmem:[%s303_s1] sm:$0xff]  ;;  %219 = vrcp.f32 %v229_v2  ;;  %v15_v28 = vld [vmem:[%s303_s1 + $0x18] sm:$0xff]  ;;  %v14_v30 = vld [vmem:[%s303_s1 + $0x10] sm:$0xff] }
   0x2   :  { %v11_v1 = vld [vmem:[%s304_s0] sm:$0xff]  ;;  %41 = vmatpush.msra.mxu0 %v12_v0  ;;  %v13_v31 = vld [vmem:[%s303_s1 + $0x8] sm:$0xff] }
   0x3   :  { %215 = vmatmul.msk.f32.vlgmr.msra.gmra.mxu0 %vm22_vm0, %v11_v1  ;;  %v16_v26 = vld [vmem:[%s303_s1 + $0x20] sm:$0xff]  ;;  %v272_v38 = vld [vmem:[%s303_s1 + $0x48] sm:$0xff] }
   0x4   :  { %111 = vmatpush.msra.mxu1 %v16_v26 }
   0x6   :  { %112 = vmatpush.msra.mxu1 %v15_v28  ;;  %v161_v28 = vperm.slane %v272_v38, 4 }
   0x7   :  { %v220_v3 = vpop.eup %219 }
   0x8   :  { %v55_v4 = vmul.f32 8.0, %v220_v3  ;;  %vm59_vm2 = vweird.f32 %v220_v3  ;;  %113 = vmatpush.msra.mxu1 %v14_v30 }
   0xa   :  { %v56_v5 = vsub.f32 1.0, %v55_v4  ;;  %114 = vmatpush.msra.mxu1 %v13_v31  ;;  %v20_v4 = vld [vmem:[%s303_s1 + $0x40] sm:$0xff] }
   0xb   :  { %177 = vmatpush.msra.mxu2 %v20_v4 }
   0xc   :  { %v57_v9 = vmul.f32 %v220_v3, %v56_v5 }
   0xe   :  { %v58_v12 = vadd.f32 %v220_v3, %v57_v9  ;;  %v17_v9 = vld [vmem:[%s303_s1 + $0x28] sm:$0xff] }
  0x10   :  { %v252_v15 = vsel %vm59_vm2, %v220_v3, %v58_v12 }
  0x80   :  { %v43_v6 = vpop.f32.mrf.mxu0 }
  0x81   :  { %v47_v7 = vsel %vm46_vm1, %v43_v6, 0.0 }
  0x82   :  { %v48_v8 = vrot.slane %v47_v7, 4 }
  0x84   :  { %v49_v10 = vadd.f32 %v48_v8, %v47_v7  ;;  %v18_v8 = vld [vmem:[%s303_s1 + $0x30] sm:$0xff] }
  0x86   :  { %v50_v11 = vrot.slane %v49_v10, 2 }
  0x88   :  { %v51_v13 = vadd.f32 %v50_v11, %v49_v10 }
  0x8a   :  { %v52_v14 = vrot.slane %v51_v13, 1 }
  0x8c   :  { %v53_v16 = vadd.f32 %v52_v14, %v51_v13 }
  0x8e   :  { %v61_v17 = vmul.f32 %v252_v15, %v53_v16 }
  0x90   :  { %v62_v18 = vsub.f32 %v43_v6, %v61_v17 }
  0x92   :  { %v63_v19 = vmul.f32 %v62_v18, %v62_v18 }
  0x94   :  { %v64_v20 = vsel %vm46_vm1, %v63_v19, 0.0 }
  0x95   :  { %v65_v21 = vrot.slane %v64_v20, 4 }
  0x97   :  { %v66_v22 = vadd.f32 %v65_v21, %v64_v20 }
  0x99   :  { %v67_v23 = vrot.slane %v66_v22, 2 }
  0x9b   :  { %v68_v24 = vadd.f32 %v67_v23, %v66_v22 }
  0x9d   :  { %v69_v25 = vrot.slane %v68_v24, 1 }
  0x9f   :  { %v70_v27 = vadd.f32 %v69_v25, %v68_v24 }
  0xa1   :  { %v71_v29 = vmul.f32 %v70_v27, %v252_v15 }
  0xa3   :  { %v72_v32 = vadd.f32 1e-05, %v71_v29 }
  0xa5   :  { %221 = vrsqrt.f32 %v72_v32  ;;  %vm79_vm4 = vweird.f32 %v72_v32 }
  0xab   :  { %v222_v33 = vpop.eup %221 }
  0xac   :  { %v74_v34 = vmul.f32 %v222_v33, %v72_v32  ;;  %vm80_vm3 = vweird.f32 %v222_v33 }
  0xad   :  { %vm81_vm5 = vmor %vm79_vm4, %vm80_vm3 }
  0xae   :  { %v75_v35 = vmul.f32 %v222_v33, %v74_v34 }
  0xb0   :  { %v76_v36 = vmul.f32 0.5, %v75_v35 }
  0xb2   :  { %v77_v37 = vsub.f32 1.5, %v76_v36 }
  0xb4   :  { %v78_v39 = vmul.f32 %v222_v33, %v77_v37 }
  0xb6   :  { %v82_v40 = vsel %vm81_vm5, %v222_v33, %v78_v39 }
  0xb7   :  { %v83_v41 = vmul.f32 %v82_v40, %v272_v38 }
  0xb9   :  { %v84_v42 = vmul.f32 %v83_v41, %v61_v17  ;;  %v89_v44 = vperm.slane %v83_v41, 0 }
  0xbb   :  { %v86_v43 = vrot.slane %v84_v42, 7  ;;  %v90_v46 = vmul.f32 %v89_v44, %v43_v6  ;;  %v19_v6 = vld [vmem:[%s303_s1 + $0x38] sm:$0xff] }
  0xbc   :  { %178 = vmatpush.msra.mxu2 %v19_v6 }
  0xbd   :  { %v88_v45 = vsub.f32 %v272_v38, %v86_v43 }
  0xbe   :  { %179 = vmatpush.msra.mxu2 %v18_v8 }
  0xbf   :  { %v91_v47 = vperm.slane %v88_v45, 1 }
  0xc0   :  { %180 = vmatpush.msra.mxu2 %v17_v9 }
  0xc1   :  { %v92_v48 = vadd.f32 %v91_v47, %v90_v46 }
  0xc3   :  { %vm93_vm6 = vcmp.gt.f32.partialorder %v92_v48, 0.0  ;;  %v94_v49 = vmul.f32 0.01, %v92_v48 }
  0xc5   :  { %v95_v50 = vsel %vm93_vm6, %v92_v48, %v94_v49 }
  0xc6   :  { %216 = vmatmul.msk.f32.vlgmr.msra.gmra.mxu1 %vm46_vm1, %v95_v50 }
 0x143   :  { %v116_v51 = vpop.f32.mrf.mxu1 }
 0x144   :  { %v119_v52 = vsel %vm46_vm1, %v116_v51, 0.0 }
 0x145   :  { %v120_v53 = vrot.slane %v119_v52, 4 }
 0x147   :  { %v121_v54 = vadd.f32 %v120_v53, %v119_v52 }
 0x149   :  { %v122_v55 = vrot.slane %v121_v54, 2 }
 0x14b   :  { %v123_v56 = vadd.f32 %v122_v55, %v121_v54 }
 0x14d   :  { %v124_v57 = vrot.slane %v123_v56, 1 }
 0x14f   :  { %v125_v58 = vadd.f32 %v124_v57, %v123_v56 }
 0x151   :  { %v126_v59 = vmul.f32 %v125_v58, %v252_v15 }
 0x153   :  { %v127_v60 = vsub.f32 %v116_v51, %v126_v59 }
 0x155   :  { %v128_v61 = vmul.f32 %v127_v60, %v127_v60 }
 0x157   :  { %v129_v62 = vsel %vm46_vm1, %v128_v61, 0.0 }
 0x158   :  { %v130_v63 = vrot.slane %v129_v62, 4 }
 0x15a   :  { %v131_v0 = vadd.f32 %v130_v63, %v129_v62 }
 0x15c   :  { %v132_v1 = vrot.slane %v131_v0, 2 }
 0x15e   :  { %v133_v2 = vadd.f32 %v132_v1, %v131_v0 }
 0x160   :  { %v134_v3 = vrot.slane %v133_v2, 1 }
 0x162   :  { %v135_v5 = vadd.f32 %v134_v3, %v133_v2 }
 0x164   :  { %v136_v7 = vmul.f32 %v135_v5, %v252_v15 }
 0x166   :  { %v137_v10 = vadd.f32 1e-05, %v136_v7 }
 0x168   :  { %223 = vrsqrt.f32 %v137_v10  ;;  %vm144_vm8 = vweird.f32 %v137_v10 }
 0x16e   :  { %v224_v11 = vpop.eup %223 }
 0x16f   :  { %v139_v12 = vmul.f32 %v224_v11, %v137_v10  ;;  %vm145_vm7 = vweird.f32 %v224_v11 }
 0x170   :  { %vm146_vm9 = vmor %vm144_vm8, %vm145_vm7 }
 0x171   :  { %v140_v13 = vmul.f32 %v224_v11, %v139_v12 }
 0x173   :  { %v141_v14 = vmul.f32 0.5, %v140_v13 }
 0x175   :  { %v142_v16 = vsub.f32 1.5, %v141_v14 }
 0x177   :  { %v143_v15 = vmul.f32 %v224_v11, %v142_v16 }
 0x179   :  { %v147_v17 = vsel %vm146_vm9, %v224_v11, %v143_v15 }
 0x17a   :  { %v148_v18 = vmul.f32 %v147_v17, %v272_v38 }
 0x17c   :  { %v149_v19 = vmul.f32 %v148_v18, %v126_v59  ;;  %v154_v21 = vperm.slane %v148_v18, 2 }
 0x17e   :  { %v151_v20 = vrot.slane %v149_v19, 7  ;;  %v155_v23 = vmul.f32 %v154_v21, %v116_v51 }
 0x180   :  { %v153_v22 = vsub.f32 %v272_v38, %v151_v20 }
 0x182   :  { %v156_v24 = vperm.slane %v153_v22, 3 }
 0x184   :  { %v157_v25 = vadd.f32 %v156_v24, %v155_v23 }
 0x186   :  { %vm158_vm10 = vcmp.gt.f32.partialorder %v157_v25, 0.0  ;;  %v159_v26 = vmul.f32 0.01, %v157_v25 }
 0x188   :  { %v160_v27 = vsel %vm158_vm10, %v157_v25, %v159_v26 }
 0x189   :  { %217 = vmatmul.msk.f32.vlgmr.msra.gmra.mxu2 %vm46_vm1, %v160_v27 }
 0x20c   :  { %v182_v29 = vpop.f32.mrf.mxu2 }
 0x20d   :  { %v183_v30 = vadd.f32 %v182_v29, %v161_v28 }
 0x20f   :  { %v186_v31 = vsel %vm185_vm11, %v183_v30, -inf }
 0x210   :  { %187 = vmax.xlane.f32.xlu0 %v186_v31 }
 0x283   :  { %v188_v32 = vpop.xlane.xlu0 %187 }
 0x284   :  { %v189_v33 = vsub.f32 %v183_v30, %v188_v32 }
 0x286   :  { %v190_v34 = vmul.f32 1.442695, %v189_v33 }
 0x288   :  { %225 = vpow2.f32 %v190_v34 }
 0x28e   :  { %v226_v35 = vpop.eup %225 }
 0x28f   :  { %v192_v36 = vsel %vm185_vm11, %v226_v35, 0.0 }
 0x290   :  { %193 = vadd.xlane.f32.xlu0 %v192_v36 }
 0x303   :  { %v194_v37 = vpop.xlane.xlu0 %193 }
 0x304   :  { %227 = vrcp.f32 %v194_v37  ;;  %v206_v38 = vand.u32 2147483648, %v194_v37  ;;  %v204_v43 = vand.u32 2147483647, %v194_v37  ;;  %vm200_vm13 = vweird.f32 %v194_v37 }
 0x306   :  { %v207_v45 = vor.u32 1.1754944e-38, %v206_v38  ;;  %vm205_vm15 = vcmp.eq.f32.partialorder %v204_v43, 8.507059e+37 }
 0x30a   :  { %v228_v39 = vpop.eup %227 }
 0x30b   :  { %v196_v40 = vmul.f32 %v228_v39, %v194_v37  ;;  %vm201_vm12 = vweird.f32 %v228_v39 }
 0x30c   :  { %vm202_vm14 = vmor %vm200_vm13, %vm201_vm12 }
 0x30d   :  { %v197_v41 = vsub.f32 1.0, %v196_v40 }
 0x30f   :  { %v198_v42 = vmul.f32 %v228_v39, %v197_v41 }
 0x311   :  { %v199_v44 = vadd.f32 %v228_v39, %v198_v42 }
 0x313   :  { %v203_v46 = vsel %vm202_vm14, %v228_v39, %v199_v44 }
 0x314   :  { %v208_v47 = vsel %vm205_vm15, %v207_v45, %v203_v46 }
 0x315   :  { %v209_v48 = vmul.f32 %v226_v35, %v208_v47 }
 0x317   :  { %210 = vst.msk [vmem:[%s305_s2] sm:$0xff] %vm185_vm11, %v209_v48 }

</bundles_post_ra>
